<compile_context>
chip_gen: v7x
topology: tpu7x:2x2x1
jax: 0.10.0
libtpu: 0.0.40
codegen_flags: <defaults>
</compile_context>

<pallas_src>
import math
import jax
import jax.numpy as jnp
from jax.experimental import pallas as pl
from jax.experimental.pallas import tpu as pltpu


def _round_up(x, m):
    return (x + m - 1) // m * m


def _generator_kernel(x_ref, w1_ref, b1_ref, w2_ref, b2_ref, o_ref):
    # Cast the f32 input tile to bf16 in-kernel (VPU, hidden under DMA slack),
    # then run both matmuls on the MXU with f32 accumulation.
    x = x_ref[...].astype(w1_ref.dtype)
    h = jnp.dot(x, w1_ref[...], preferred_element_type=jnp.float32)
    # Bias-add + ReLU in f32 on the accumulator (VPU filler).
    h = jnp.maximum(h + b1_ref[...], 0.0)
    out = jnp.dot(h.astype(w2_ref.dtype), w2_ref[...],
                  preferred_element_type=jnp.float32)
    o_ref[...] = (out + b2_ref[...]).astype(o_ref.dtype)


def prepare_generator_params(w1, b1, w2, b2, compute_dtype=jnp.bfloat16):
    """One-time preparation (call at init, NOT per forward):
    weights -> compute dtype for the MXU; biases -> f32, 2-D for broadcasting."""
    w1_p = w1.astype(compute_dtype)
    w2_p = w2.astype(compute_dtype)
    b1_p = jnp.asarray(b1, jnp.float32).reshape(1, -1)
    b2_p = jnp.asarray(b2, jnp.float32).reshape(1, -1)
    return w1_p, b1_p, w2_p, b2_p


def _choose_tile(B, block_b):
    """Batch tile: multiple of 16 (bf16 sublane packing), and for multi-tile
    batches aim for >= 4 grid steps so v7x's 2 TCs each pipeline >= 2 steps."""
    block_b = max(16, _round_up(block_b, 16))
    target = max(16, _round_up(pl.cdiv(B, 4), 16))
    return min(block_b, target)


def generator_forward(x, w1, b1, w2, b2, *, block_b=1024):
    """x: [B, z] f32; w1: [z, H] bf16; b1: [1, H] f32; w2: [H, d] bf16;
    b2: [1, d] f32  ->  [B, d] f32.  Pass params through prepare_generator_params."""
    B, z = x.shape
    H = w1.shape[1]
    d = w2.shape[1]

    tb = _choose_tile(B, block_b)
    b_p = _round_up(B, tb)
    n_tiles = b_p // tb

    # Only the batch dim is padded (zeros); padded rows are sliced off below.
    x_p = jnp.pad(x, ((0, b_p - B), (0, 0))) if b_p != B else x

    w_itemsize = jnp.dtype(w1.dtype).itemsize
    cost = pl.CostEstimate(
        flops=2 * b_p * (z * H + H * d),
        transcendentals=0,
        bytes_accessed=(b_p * z * 4                      # x read (f32, unpadded)
                        + w1.size * w_itemsize + w2.size * w_itemsize
                        + b1.size * 4 + b2.size * 4      # resident params
                        + b_p * d * 4),                  # output write (unpadded)
    )

    out = pl.pallas_call(
        _generator_kernel,
        out_shape=jax.ShapeDtypeStruct((b_p, d), jnp.float32),
        grid=(n_tiles,),
        in_specs=[
            pl.BlockSpec((tb, z), lambda i: (i, 0)),     # x tile (pipelined)
            pl.BlockSpec((z, H), lambda i: (0, 0)),      # W1 resident
            pl.BlockSpec((1, H), lambda i: (0, 0)),      # b1 resident
            pl.BlockSpec((H, d), lambda i: (0, 0)),      # W2 resident
            pl.BlockSpec((1, d), lambda i: (0, 0)),      # b2 resident
        ],
        out_specs=pl.BlockSpec((tb, d), lambda i: (i, 0)),
        compiler_params=pltpu.CompilerParams(
            dimension_semantics=("parallel",),   # megacore split on v7x
            vmem_limit_bytes=32 * 1024 * 1024,   # ample on v5e/v6e/v7x; tiles are small
        ),
        cost_estimate=cost,
    )(x_p, w1, b1, w2, b2)

    return out[:B] if b_p != B else out


def init_generator_params(key, latent_size, output_size, conditional=True,
                          dtype=jnp.float32):
    """Deterministic init matching nn.Linear default (uniform +/- 1/sqrt(fan_in))."""
    z = latent_size + 1 if conditional else latent_size
    d = output_size if conditional else output_size + 1
    hidden = 2 * latent_size

    k1, k2, k3, k4 = jax.random.split(key, 4)
    bound1 = 1.0 / math.sqrt(z)
    bound2 = 1.0 / math.sqrt(hidden)
    # PyTorch weight is [out, in]; store transposed [in, out] for the kernel.
    w1 = jax.random.uniform(k1, (z, hidden), dtype, -bound1, bound1)
    b1 = jax.random.uniform(k2, (1, hidden), dtype, -bound1, bound1)
    w2 = jax.random.uniform(k3, (hidden, d), dtype, -bound2, bound2)
    b2 = jax.random.uniform(k4, (1, d), dtype, -bound2, bound2)
    return w1, b1, w2, b2


def _ref_f32(x, w1, b1, w2, b2):
    return jnp.maximum(x @ w1 + b1, 0.0) @ w2 + b2


def _ref_bf16(x, w1, b1, w2, b2):
    # Emulates the kernel's mixed precision: bf16 matmul inputs, f32 accumulate.
    # NOTE: the kernel implements bf16-in / f32-accumulate Linear layers, not a
    # bit-faithful f32 Linear; tolerances vs. the f32 reference scale with fan-in.
    h = jnp.dot(x.astype(jnp.bfloat16), w1.astype(jnp.bfloat16),
                preferred_element_type=jnp.float32) + b1
    h = jnp.maximum(h, 0.0)
    return jnp.dot(h.astype(jnp.bfloat16), w2.astype(jnp.bfloat16),
                   preferred_element_type=jnp.float32) + b2


if __name__ == "__main__":
    latent_size = 32
    output_size = 16
    conditional = True

    key = jax.random.PRNGKey(0)
    kx, kp, kx2 = jax.random.split(key, 3)

    z_in = latent_size + 1 if conditional else latent_size
    d_out = output_size if conditional else output_size + 1
    w1, b1, w2, b2 = init_generator_params(kp, latent_size, output_size,
                                           conditional)
    # One-time parameter preparation (hoisted out of the forward pass).
    w1_k, b1_k, w2_k, b2_k = prepare_generator_params(w1, b1, w2, b2)

    # Small shape (single tile, batch padded up to the 16-row tile).
    batch = 8
    x = jax.random.normal(kx, (batch, z_in), dtype=jnp.float32)
    out = jax.block_until_ready(generator_forward(x, w1_k, b1_k, w2_k, b2_k))
    assert out.shape == (batch, d_out)
    assert jnp.allclose(out, _ref_f32(x, w1, b1, w2, b2), atol=5e-2, rtol=5e-2)
    assert jnp.allclose(out, _ref_bf16(x, w1, b1, w2, b2), atol=2e-3, rtol=2e-3)

    # Larger batch to exercise the multi-tile (grid >= 4) pipelined path.
    batch2 = 1024
    x2 = jax.random.normal(kx2, (batch2, z_in), dtype=jnp.float32)
    out2 = jax.block_until_ready(generator_forward(x2, w1_k, b1_k, w2_k, b2_k))
    assert out2.shape == (batch2, d_out)
    assert jnp.allclose(out2, _ref_f32(x2, w1, b1, w2, b2), atol=5e-2, rtol=5e-2)
    assert jnp.allclose(out2, _ref_bf16(x2, w1, b1, w2, b2), atol=2e-3, rtol=2e-3)

    print("KERNEL_OK")
</pallas_src>

<mosaic_0001>
module attributes {stable_mosaic.version = 11 : i64} {
  func.func @_generator_kernel(%arg0: i32, %arg1: memref<16x33xf32, #tpu.memory_space<vmem>>, %arg2: memref<33x64xbf16, #tpu.memory_space<vmem>>, %arg3: memref<1x64xf32, #tpu.memory_space<vmem>>, %arg4: memref<64x16xbf16, #tpu.memory_space<vmem>>, %arg5: memref<1x16xf32, #tpu.memory_space<vmem>>, %arg6: memref<16x16xf32, #tpu.memory_space<vmem>>) attributes {dimension_semantics = [#tpu.dimension_semantics<parallel>], iteration_bounds = array<i64: 1>, scalar_prefetch = 0 : i64, scratch_operands = 0 : i64, tpu.core_type = #tpu.core_type<tc>, window_params = [{transform_indices = @transform_0, window_bounds = array<i64: 16, 33>}, {pipeline_mode = #tpu.pipeline_mode<synchronous>, transform_indices = @transform_1, window_bounds = array<i64: 33, 64>}, {pipeline_mode = #tpu.pipeline_mode<synchronous>, transform_indices = @transform_2, window_bounds = array<i64: 1, 64>}, {pipeline_mode = #tpu.pipeline_mode<synchronous>, transform_indices = @transform_3, window_bounds = array<i64: 64, 16>}, {pipeline_mode = #tpu.pipeline_mode<synchronous>, transform_indices = @transform_4, window_bounds = array<i64: 1, 16>}, {transform_indices = @transform_5, window_bounds = array<i64: 16, 16>}]} {
    %c0 = arith.constant 0 : index
    %c0_0 = arith.constant 0 : index
    %0 = vector.load %arg1[%c0, %c0_0] : memref<16x33xf32, #tpu.memory_space<vmem>>, vector<16x33xf32>
    %1 = arith.truncf %0 : vector<16x33xf32> to vector<16x33xbf16>
    %c0_1 = arith.constant 0 : index
    %c0_2 = arith.constant 0 : index
    %2 = vector.load %arg2[%c0_1, %c0_2] : memref<33x64xbf16, #tpu.memory_space<vmem>>, vector<33x64xbf16>
    %cst = arith.constant dense<0.000000e+00> : vector<16x64xf32>
    %3 = tpu.matmul %1, %2, %cst {dimension_numbers = #tpu.dot_dimension_numbers<[1], [0], [0], [1], [0, 0, 1, 1], [], []>} : vector<16x33xbf16>, vector<33x64xbf16>, vector<16x64xf32> -> vector<16x64xf32>
    %c0_3 = arith.constant 0 : index
    %c0_4 = arith.constant 0 : index
    %4 = vector.load %arg3[%c0_3, %c0_4] : memref<1x64xf32, #tpu.memory_space<vmem>>, vector<1x64xf32>
    %5 = vector.broadcast %4 : vector<1x64xf32> to vector<16x64xf32>
    %6 = arith.addf %3, %5 : vector<16x64xf32>
    %cst_5 = arith.constant 0.000000e+00 : f32
    %7 = vector.broadcast %cst_5 : f32 to vector<16x64xf32>
    %8 = arith.maximumf %6, %7 : vector<16x64xf32>
    %9 = arith.truncf %8 : vector<16x64xf32> to vector<16x64xbf16>
    %c0_6 = arith.constant 0 : index
    %c0_7 = arith.constant 0 : index
    %10 = vector.load %arg4[%c0_6, %c0_7] : memref<64x16xbf16, #tpu.memory_space<vmem>>, vector<64x16xbf16>
    %cst_8 = arith.constant dense<0.000000e+00> : vector<16x16xf32>
    %11 = tpu.matmul %9, %10, %cst_8 {dimension_numbers = #tpu.dot_dimension_numbers<[1], [0], [0], [1], [0, 0, 1, 1], [], []>} : vector<16x64xbf16>, vector<64x16xbf16>, vector<16x16xf32> -> vector<16x16xf32>
    %c0_9 = arith.constant 0 : index
    %c0_10 = arith.constant 0 : index
    %12 = vector.load %arg5[%c0_9, %c0_10] : memref<1x16xf32, #tpu.memory_space<vmem>>, vector<1x16xf32>
    %13 = vector.broadcast %12 : vector<1x16xf32> to vector<16x16xf32>
    %14 = arith.addf %11, %13 : vector<16x16xf32>
    %c0_11 = arith.constant 0 : index
    %c0_12 = arith.constant 0 : index
    %15 = vector.load %arg6[%c0_11, %c0_12] : memref<16x16xf32, #tpu.memory_space<vmem>>, vector<16x16xf32>
    tpu.vector_store %arg6[%c0_11, %c0_12], %14 {strides = array<i32>} : memref<16x16xf32, #tpu.memory_space<vmem>>, vector<16x16xf32>,
    return
  }
  func.func @transform_0(%arg0: i32) -> (i32, i32) {
    %c0_i32 = arith.constant 0 : i32
    %c0_i32_0 = arith.constant 0 : i32
    return %arg0, %c0_i32 : i32, i32
  }
  func.func @transform_1(%arg0: i32) -> (i32, i32) {
    %c0_i32 = arith.constant 0 : i32
    %c0_i32_0 = arith.constant 0 : i32
    %c0_i32_1 = arith.constant 0 : i32
    return %c0_i32, %c0_i32_0 : i32, i32
  }
  func.func @transform_2(%arg0: i32) -> (i32, i32) {
    %c0_i32 = arith.constant 0 : i32
    %c0_i32_0 = arith.constant 0 : i32
    %c0_i32_1 = arith.constant 0 : i32
    return %c0_i32, %c0_i32_0 : i32, i32
  }
  func.func @transform_3(%arg0: i32) -> (i32, i32) {
    %c0_i32 = arith.constant 0 : i32
    %c0_i32_0 = arith.constant 0 : i32
    %c0_i32_1 = arith.constant 0 : i32
    return %c0_i32, %c0_i32_0 : i32, i32
  }
  func.func @transform_4(%arg0: i32) -> (i32, i32) {
    %c0_i32 = arith.constant 0 : i32
    %c0_i32_0 = arith.constant 0 : i32
    %c0_i32_1 = arith.constant 0 : i32
    return %c0_i32, %c0_i32_0 : i32, i32
  }
  func.func @transform_5(%arg0: i32) -> (i32, i32) {
    %c0_i32 = arith.constant 0 : i32
    %c0_i32_0 = arith.constant 0 : i32
    return %arg0, %c0_i32 : i32, i32
  }
}

</mosaic_0001>

<bundles_post_ra>
// kernel: tpu_custom_call.1
= control target key start
LH: loop header
LB: loop body
LE: loop exit
PB: predicated region body
PF: predicated region fallthrough
CT: control target
= control target key end

     0   :  { %v288_v1 = vmov 0.0   ;;  %vm56_vm0 = vcmask 1040384   ;;  %v289_v4 = vmov 0   ;;  %vm290_vm1 = vmmov 0   ;;  %s369_s0 = inlined_call_operand.vmem [shape: f32[16,33], index: 0, kind: input, shape index: {}]   ;;  %s370_s1 = inlined_call_operand.vmem [shape: bf16[33,64], index: 1, kind: input, shape index: {}]   ;;  %s371_s2 = inlined_call_operand.vmem [shape: f32[1,64], index: 2, kind: input, shape index: {}]   ;;  %s372_s3 = inlined_call_operand.vmem [shape: bf16[64,16], index: 3, kind: input, shape index: {}]   ;;  %s373_s4 = inlined_call_operand.vmem [shape: f32[1,16], index: 4, kind: input, shape index: {}]   ;;  %s374_s5 = inlined_call_operand.hbm [shape: f32[16,16], index: 5, kind: output, shape index: {}]  }
   0x1   :  { %v257_v0 = vld [vmem:[%s370_s1] sm:$0xff]   ;;  %229 = vmatprep.subr.bf16.mxu0 %v288_v1  ;;  %v258_v2 = vld [vmem:[%s370_s1 + $0x8] sm:$0xff]   ;;  %239 = vmatprep.subr.bf16.mxu1 %v288_v1  ;;  %v259_v3 = vld [vmem:[%s370_s1 + $0x10] ss:$0 sps:$4 sm:$0x11]   ;;  %v58_v5 = vsel %vm56_vm0, 65535, %v289_v4 }
   0x2   :  { %230 = vmatpush3.bf16.msra.mxu0 %v257_v0  ;;  %v260_v6 = vld [vmem:[%s372_s3] sm:$0xff]   ;;  %235 = vmatprep.mubr.msk.bf16.mxu0 %vm290_vm1, %v288_v1  ;;  %v23_v8 = vld [vmem:[%s369_s0 + $0x8] sm:$0xff]  ;;  %v60_v10 = vand.u32 %v259_v3, %v58_v5 }
   0x3   :  { %231 = vmatprep.subr.bf16.mxu0 %v288_v1  ;;  %v22_v7 = vld [vmem:[%s369_s0] sm:$0xff]  ;;  %247 = vmatprep.mubr.msk.bf16.mxu1 %vm290_vm1, %v288_v1  ;;  %v261_v9 = vld [vmem:[%s372_s3 + $0x8] sm:$0xff]  }
   0x4   :  { %240 = vmatpush3.bf16.msra.mxu1 %v260_v6 }
   0x5   :  { %241 = vmatprep.subr.bf16.mxu1 %v288_v1 }
   0x6   :  { %232 = vmatpush3.bf16.msra.mxu0 %v258_v2 }
   0x7   :  { %233 = vmatprep.subr.bf16.mxu0 %v288_v1 }
   0x8   :  { %10 = vsyncpa [#allocation3], 0  ;;  %v24_v11 = vpack.c.bf16 %v23_v8, %v22_v7  ;;  %242 = vmatpush3.bf16.msra.mxu1 %v261_v9  ;;  %vm52_vm2 = vcmask 269312   ;;  %v262_v12 = vld [vmem:[%s372_s3 + $0x10] sm:$0xff]   ;;  %v263_v13 = vld [vmem:[%s372_s3 + $0x18] sm:$0xff]   ;;  %vm145_vm3 = vcmask 523264  }
   0x9   :  { %243 = vmatprep.subr.bf16.mxu1 %v288_v1  ;;  %v209_v14 = vld [vmem:[%s371_s2] ss:$0 sm:$0xff]  ;;  %s291_s3 = smov [#allocation2]   ;;  %vm190_vm4 = vcmask 130048  }
   0xa   :  { %234 = vmatpush3.bf16.msra.mxu0 %v60_v10  ;;  %v214_v24 = vld [vmem:[%s373_s4] ss:$0 sm:$0xff]  ;;  %s198_s13 = sshll.u32 %s291_s3, 4  ;;  %s199_s13 = int_to_ptr.vmem [resolvable:$true] %s198_s13 }
   0xb   :  { %s264_s2 = scalar_lea.vmem %s199_s13, 256  ;;  %p269_p1 = scmp.lt.s32.totalorder %s199_s13, %s199_s13 }
   0xc   :  { %244 = vmatpush3.bf16.msra.mxu1 %v262_v12  ;;  %p265_p0 = scmp.ne.s32.totalorder %s199_s13, %s264_s2  ;;  %p270_p2 = scmp.lt.s32.totalorder %s264_s2, %s264_s2 }
   0xd   :  { %236 = vmatmul.mubr.msk.bf16.vlgmr.msra.gmra.mrb[0].mxu0 %vm52_vm2, %v24_v11  ;;  %245 = vmatprep.subr.bf16.mxu1 %v288_v1 }
   0xe   :  { %p271_p3 = por %p270_p2, %p269_p1 }
  0x10   :  { %246 = vmatpush3.bf16.msra.mxu1 %v263_v13  ;;  %p272_p4 = pnand %p271_p3, %p265_p0 }
  0xe0   :  { %v96_v15 = vpop.f32.mrb[0].mxu0 }
  0xe1   :  { %v97_v16 = vadd.f32 %v209_v14, %v96_v15  ;;  %v237_v17 = vpop.f32.mrb[1].mxu0 }
  0xe2   :  { %v99_v18 = vpop.f32.mrb[2].mxu0 }
  0xe3   :  { %v100_v19 = vadd.f32 %v209_v14, %v99_v18  ;;  %v238_v20 = vpop.f32.mrb[3].mxu0  ;;  %v103_v21 = vmax.f32 %v97_v16, 0.0 }
  0xe5   :  { %v104_v22 = vmax.f32 %v100_v19, 0.0 }
  0xe7   :  { %v105_v23 = vpack.c.bf16 %v104_v22, %v103_v21 }
  0xe9   :  { %248 = vmatmul.mubr.msk.bf16.vlgmr.msra.gmra.mrb[0].mxu1 %vm145_vm3, %v105_v23 }
 0x1bc   :  { %v183_v25 = vpop.f32.mrb[0].mxu1 }
 0x1bd   :  { %v184_v26 = vadd.f32 %v214_v24, %v183_v25  ;;  %v249_v27 = vpop.f32.mrb[1].mxu1 }
 0x1be   :  { %v186_v28 = vpop.f32.mrb[2].mxu1 }
 0x1bf   :  { %191 = vst.msk [vmem:[#allocation2] sm:$0xff] %vm190_vm4, %v184_v26  ;;  %v187_v29 = vadd.f32 %v214_v24, %v186_v28  ;;  %v250_v30 = vpop.f32.mrb[3].mxu1 }
 0x1c1   :  { %192 = vst.msk [vmem:[#allocation2 + $0x8] sm:$0xff] %vm190_vm4, %v187_v29 }
 0x1c2   :  { %275 = shalt.err (!%p272_p4)
}
 0x1c3   :  { %s276_s15 = scalar_lea.hbm %s374_s5, 256 }
 0x1c4   :  { %p277_p5 = scmp.ne.s32.totalorder %s374_s5, %s276_s15  ;;  %p280_p6 = scmp.lt.u32.totalorder %s276_s15, %s374_s5 }
 0x1c6   :  { %p282_p7 = pnand %p280_p6, %p277_p5 }
 0x1c8   :  { %285 = shalt.err (!%p282_p7)
}
 0x1c9   :  { %s292_s20 = smov 128   ;;  %s293_s21 = smov 8  }
 0x1ca   :  { %204 = dma.vmem_to_hbm [thread:$0]  %s199_s13, 256, %s374_s5, [#allocation3], %s292_s20, %s292_s20, %s293_s21  }
 0x1cb   :  { %286 = dma.done.wait [#allocation3], 256  }
 0x1cc   :  { %287 = vsyncadd [#allocation3], 4294967040 }
 0x1cd   :  { %208 = vsyncpa [#allocation3], 1 }

</bundles_post_ra>
